<compile_context>
chip_gen: v7x
topology: tpu7x:2x2x1
jax: 0.10.0
libtpu: 0.0.40
codegen_flags: <defaults>
</compile_context>

<pallas_src>
import functools

import jax
import jax.numpy as jnp
import numpy as np
from jax.experimental import pallas as pl
from jax.experimental.pallas import tpu as pltpu

KH, KW = 4, 6
SH, SW = 2, 4
PAD = 1

# phase tap tables:  oh = 2*i + r uses (kh, dh) with ih = i + dh;  ow = 4*j + s uses (kw, dw)
H_TAPS = {0: ((1, 0), (3, -1)), 1: ((0, 1), (2, 0))}
W_TAPS = {0: ((1, 0), (5, -1)), 1: ((2, 0),), 2: ((3, 0),), 3: ((0, 1), (4, 0))}
SHIFTS = tuple((dh, dw) for dh in (-1, 0, 1) for dw in (-1, 0, 1))   # q = 3*(dh+1) + (dw+1)


def up_kernel(xpad_ref, border_ref, wall_ref, b_ref, g_ref, be_ref, psum_ref,
              o_ref, xcol_ref, *, W):
    # xpad_ref  : (Cin, M + 2W + 2)  NCHW flattened to (Cin, N*H*W), zero-padded by W+1 per side
    # border_ref: (4, M)             0/1 masks: [i>=1, i<=H-2, j>=1, j<=W-2]
    # wall_ref  : (8*Cout, 9*Cin)    block-sparse phase-major transposed-conv weight
    # b/g/be_ref: (8*Cout, 1)        conv bias / BN gamma / BN beta, tiled over the 8 phases
    # psum_ref  : (8*Cout, 8*Cout)   phase-summing matrix tile(eye(Cout), (8, 8))
    # o_ref     : (8*Cout, M)        output slab: row = (r*4+s)*Cout + co, col = n*H*W + i*W + j
    # xcol_ref  : (9*Cin, M)         im2col scratch (9 shifted, border-masked input copies)
    Cin = xpad_ref.shape[0]
    M = o_ref.shape[1]

    # ---- build im2col: 9 statically-shifted + masked copies of the flattened input ----
    for q, (dh, dw) in enumerate(SHIFTS):
        off = (W + 1) + dh * W + dw                    # static lane offset into padded input
        xs = xpad_ref[:, off:off + M]                  # (Cin, M) == x[.., i+dh, j+dw]
        if dh == -1:
            xs = xs * border_ref[0:1, :]
        elif dh == 1:
            xs = xs * border_ref[1:2, :]
        if dw == -1:
            xs = xs * border_ref[2:3, :]
        elif dw == 1:
            xs = xs * border_ref[3:4, :]
        xcol_ref[q * Cin:(q + 1) * Cin, :] = xs

    # ---- whole transposed conv as ONE MXU GEMM + bias ----
    y = jnp.dot(wall_ref[...], xcol_ref[...],
                preferred_element_type=jnp.float32) + b_ref[...]          # (8*Cout, M)

    # ---- train-mode BatchNorm2d (biased variance), folded into scale/shift ----
    inv_n = 1.0 / (8.0 * M)                                # elems/channel = N*Hout*Wout = 8*M
    ch_y = jnp.dot(psum_ref[...], y, preferred_element_type=jnp.float32)      # phase-summed
    ch_yy = jnp.dot(psum_ref[...], y * y, preferred_element_type=jnp.float32)
    mean = jnp.sum(ch_y, axis=1, keepdims=True) * inv_n                       # (8*Cout, 1)
    var = jnp.sum(ch_yy, axis=1, keepdims=True) * inv_n - mean * mean
    scale = g_ref[...] * jax.lax.rsqrt(var + 1e-5)
    shift = be_ref[...] - mean * scale
    z = y * scale + shift

    # ---- LeakyReLU(0.2), lane-dense store ----
    o_ref[...] = jnp.where(z >= 0.0, z, 0.2 * z)


@jax.jit
def up_forward(x_nchw, params):
    """Up forward. x: (N, Cin, H, W) f32 -> (N, Cout, 2*H, 4*W)."""
    N, Cin, H, W = x_nchw.shape
    Cout = params["w"].shape[1]
    M = N * H * W

    # glue (small single XLA passes): flatten, pad, constant masks / weights
    x_flat = jnp.transpose(x_nchw, (1, 0, 2, 3)).reshape(Cin, M).astype(jnp.float32)
    x_pad = jnp.pad(x_flat, ((0, 0), (W + 1, W + 1)))

    m = jnp.arange(M, dtype=jnp.int32)
    row = (m // W) % H
    col = m % W
    border = jnp.stack([row >= 1, row <= H - 2,
                        col >= 1, col <= W - 2]).astype(jnp.float32)          # (4, M)

    # block-sparse phase-major weight: W_all[p*Cout+co, q*Cin+ci] = w[ci, co, kh, kw]
    w = params["w"].astype(jnp.float32)                                       # (Cin, Cout, 4, 6)
    w_all = jnp.zeros((8 * Cout, 9 * Cin), jnp.float32)
    for r in range(2):
        for s in range(4):
            p = r * 4 + s
            for kh, dh in H_TAPS[r]:
                for kw, dw in W_TAPS[s]:
                    q = 3 * (dh + 1) + (dw + 1)
                    w_all = w_all.at[p * Cout:(p + 1) * Cout,
                                     q * Cin:(q + 1) * Cin].set(w[:, :, kh, kw].T)

    def tile8(v):                                                             # (Cout,) -> (8*Cout, 1)
        return jnp.tile(v.astype(jnp.float32).reshape(1, Cout), (8, 1)).reshape(8 * Cout, 1)

    b_t, g_t, be_t = tile8(params["b"]), tile8(params["g"]), tile8(params["be"])
    psum = jnp.tile(jnp.eye(Cout, dtype=jnp.float32), (8, 8))                 # (8*Cout, 8*Cout)

    args = (x_pad, border, w_all, b_t, g_t, be_t, psum)
    out_slab = pl.pallas_call(
        functools.partial(up_kernel, W=W),
        out_shape=jax.ShapeDtypeStruct((8 * Cout, M), jnp.float32),
        in_specs=[pl.BlockSpec(memory_space=pltpu.MemorySpace.VMEM)] * len(args),
        out_specs=pl.BlockSpec(memory_space=pltpu.MemorySpace.VMEM),
        scratch_shapes=[pltpu.VMEM((9 * Cin, M), jnp.float32)],
    )(*args)

    # un-interleave phases: (r, s, co, n, i, j) -> (n, co, 2i+r, 4j+s)
    o = out_slab.reshape(2, 4, Cout, N, H, W).transpose(3, 2, 4, 0, 5, 1)
    return o.reshape(N, Cout, SH * H, SW * W)


def up_reference(x, params):
    """Pure-JAX reference matching the PyTorch module (train-mode BN)."""
    w = params["w"].astype(jnp.float32)                                        # (Cin, Cout, 4, 6)
    w_f = jnp.transpose(jnp.flip(w, axis=(2, 3)), (1, 0, 2, 3))                # OIHW, spatially flipped
    y = jax.lax.conv_general_dilated(
        x.astype(jnp.float32), w_f, window_strides=(1, 1),
        padding=((KH - 1 - PAD, KH - 1 - PAD), (KW - 1 - PAD, KW - 1 - PAD)),
        lhs_dilation=(SH, SW),
        dimension_numbers=("NCHW", "OIHW", "NCHW"))
    y = y + params["b"][None, :, None, None]
    mean = jnp.mean(y, axis=(0, 2, 3), keepdims=True)
    var = jnp.mean((y - mean) ** 2, axis=(0, 2, 3), keepdims=True)
    y = (y - mean) * jax.lax.rsqrt(var + 1e-5)
    y = y * params["g"][None, :, None, None] + params["be"][None, :, None, None]
    return jnp.where(y >= 0, y, 0.2 * y)


def init_params(key, cin, cout):
    ks = jax.random.split(key, 4)
    return {
        "w": 0.1 * jax.random.normal(ks[0], (cin, cout, KH, KW), jnp.float32),
        "b": 0.05 * jax.random.normal(ks[1], (cout,), jnp.float32),
        "g": 1.0 + 0.1 * jax.random.normal(ks[2], (cout,), jnp.float32),
        "be": 0.1 * jax.random.normal(ks[3], (cout,), jnp.float32),
    }


if __name__ == "__main__":
    N, Cin, Cout, H, W = 2, 8, 4, 8, 16          # -> output (2, 4, 16, 64); M = 256 lanes
    key = jax.random.PRNGKey(0)
    kx, kp = jax.random.split(key)
    x = jax.random.normal(kx, (N, Cin, H, W), dtype=jnp.float32)
    params = init_params(kp, Cin, Cout)

    out = jax.block_until_ready(up_forward(x, params))
    assert out.shape == (N, Cout, SH * H, SW * W)

    ref = up_reference(x, params)
    np.testing.assert_allclose(np.asarray(out), np.asarray(ref), rtol=2e-2, atol=2e-2)
    print("KERNEL_OK")
</pallas_src>

<mosaic_0001>
module attributes {stable_mosaic.version = 11 : i64} {
  func.func @up_kernel(%arg0: memref<8x290xf32, #tpu.memory_space<vmem>>, %arg1: memref<4x256xf32, #tpu.memory_space<vmem>>, %arg2: memref<32x72xf32, #tpu.memory_space<vmem>>, %arg3: memref<32x1xf32, #tpu.memory_space<vmem>>, %arg4: memref<32x1xf32, #tpu.memory_space<vmem>>, %arg5: memref<32x1xf32, #tpu.memory_space<vmem>>, %arg6: memref<32x32xf32, #tpu.memory_space<vmem>>, %arg7: memref<32x256xf32, #tpu.memory_space<vmem>>, %arg8: memref<72x256xf32, #tpu.memory_space<vmem>>) attributes {dimension_semantics = [], scalar_prefetch = 0 : i64, scratch_operands = 1 : i64, tpu.core_type = #tpu.core_type<tc>} {
    %c0 = arith.constant 0 : index
    %c0_0 = arith.constant 0 : index
    %0 = vector.load %arg0[%c0, %c0_0] : memref<8x290xf32, #tpu.memory_space<vmem>>, vector<8x256xf32>
    %c0_1 = arith.constant 0 : index
    %c0_2 = arith.constant 0 : index
    %1 = vector.load %arg1[%c0_1, %c0_2] : memref<4x256xf32, #tpu.memory_space<vmem>>, vector<1x256xf32>
    %2 = vector.broadcast %1 : vector<1x256xf32> to vector<8x256xf32>
    %3 = arith.mulf %0, %2 : vector<8x256xf32>
    %c2 = arith.constant 2 : index
    %c0_3 = arith.constant 0 : index
    %4 = vector.load %arg1[%c2, %c0_3] : memref<4x256xf32, #tpu.memory_space<vmem>>, vector<1x256xf32>
    %5 = vector.broadcast %4 : vector<1x256xf32> to vector<8x256xf32>
    %6 = arith.mulf %3, %5 : vector<8x256xf32>
    %c0_4 = arith.constant 0 : index
    %c0_5 = arith.constant 0 : index
    %7 = vector.load %arg8[%c0_4, %c0_5] : memref<72x256xf32, #tpu.memory_space<vmem>>, vector<8x256xf32>
    tpu.vector_store %arg8[%c0_4, %c0_5], %6 {strides = array<i32>} : memref<72x256xf32, #tpu.memory_space<vmem>>, vector<8x256xf32>,
    %c0_6 = arith.constant 0 : index
    %c1 = arith.constant 1 : index
    %8 = vector.load %arg0[%c0_6, %c1] : memref<8x290xf32, #tpu.memory_space<vmem>>, vector<8x256xf32>
    %c0_7 = arith.constant 0 : index
    %c0_8 = arith.constant 0 : index
    %9 = vector.load %arg1[%c0_7, %c0_8] : memref<4x256xf32, #tpu.memory_space<vmem>>, vector<1x256xf32>
    %10 = vector.broadcast %9 : vector<1x256xf32> to vector<8x256xf32>
    %11 = arith.mulf %8, %10 : vector<8x256xf32>
    %c8 = arith.constant 8 : index
    %c0_9 = arith.constant 0 : index
    %12 = vector.load %arg8[%c8, %c0_9] : memref<72x256xf32, #tpu.memory_space<vmem>>, vector<8x256xf32>
    tpu.vector_store %arg8[%c8, %c0_9], %11 {strides = array<i32>} : memref<72x256xf32, #tpu.memory_space<vmem>>, vector<8x256xf32>,
    %c0_10 = arith.constant 0 : index
    %c2_11 = arith.constant 2 : index
    %13 = vector.load %arg0[%c0_10, %c2_11] : memref<8x290xf32, #tpu.memory_space<vmem>>, vector<8x256xf32>
    %c0_12 = arith.constant 0 : index
    %c0_13 = arith.constant 0 : index
    %14 = vector.load %arg1[%c0_12, %c0_13] : memref<4x256xf32, #tpu.memory_space<vmem>>, vector<1x256xf32>
    %15 = vector.broadcast %14 : vector<1x256xf32> to vector<8x256xf32>
    %16 = arith.mulf %13, %15 : vector<8x256xf32>
    %c3 = arith.constant 3 : index
    %c0_14 = arith.constant 0 : index
    %17 = vector.load %arg1[%c3, %c0_14] : memref<4x256xf32, #tpu.memory_space<vmem>>, vector<1x256xf32>
    %18 = vector.broadcast %17 : vector<1x256xf32> to vector<8x256xf32>
    %19 = arith.mulf %16, %18 : vector<8x256xf32>
    %c16 = arith.constant 16 : index
    %c0_15 = arith.constant 0 : index
    %20 = vector.load %arg8[%c16, %c0_15] : memref<72x256xf32, #tpu.memory_space<vmem>>, vector<8x256xf32>
    tpu.vector_store %arg8[%c16, %c0_15], %19 {strides = array<i32>} : memref<72x256xf32, #tpu.memory_space<vmem>>, vector<8x256xf32>,
    %c0_16 = arith.constant 0 : index
    %c16_17 = arith.constant 16 : index
    %21 = vector.load %arg0[%c0_16, %c16_17] : memref<8x290xf32, #tpu.memory_space<vmem>>, vector<8x256xf32>
    %c2_18 = arith.constant 2 : index
    %c0_19 = arith.constant 0 : index
    %22 = vector.load %arg1[%c2_18, %c0_19] : memref<4x256xf32, #tpu.memory_space<vmem>>, vector<1x256xf32>
    %23 = vector.broadcast %22 : vector<1x256xf32> to vector<8x256xf32>
    %24 = arith.mulf %21, %23 : vector<8x256xf32>
    %c24 = arith.constant 24 : index
    %c0_20 = arith.constant 0 : index
    %25 = vector.load %arg8[%c24, %c0_20] : memref<72x256xf32, #tpu.memory_space<vmem>>, vector<8x256xf32>
    tpu.vector_store %arg8[%c24, %c0_20], %24 {strides = array<i32>} : memref<72x256xf32, #tpu.memory_space<vmem>>, vector<8x256xf32>,
    %c0_21 = arith.constant 0 : index
    %c17 = arith.constant 17 : index
    %26 = vector.load %arg0[%c0_21, %c17] : memref<8x290xf32, #tpu.memory_space<vmem>>, vector<8x256xf32>
    %c32 = arith.constant 32 : index
    %c0_22 = arith.constant 0 : index
    %27 = vector.load %arg8[%c32, %c0_22] : memref<72x256xf32, #tpu.memory_space<vmem>>, vector<8x256xf32>
    tpu.vector_store %arg8[%c32, %c0_22], %26 {strides = array<i32>} : memref<72x256xf32, #tpu.memory_space<vmem>>, vector<8x256xf32>,
    %c0_23 = arith.constant 0 : index
    %c18 = arith.constant 18 : index
    %28 = vector.load %arg0[%c0_23, %c18] : memref<8x290xf32, #tpu.memory_space<vmem>>, vector<8x256xf32>
    %c3_24 = arith.constant 3 : index
    %c0_25 = arith.constant 0 : index
    %29 = vector.load %arg1[%c3_24, %c0_25] : memref<4x256xf32, #tpu.memory_space<vmem>>, vector<1x256xf32>
    %30 = vector.broadcast %29 : vector<1x256xf32> to vector<8x256xf32>
    %31 = arith.mulf %28, %30 : vector<8x256xf32>
    %c40 = arith.constant 40 : index
    %c0_26 = arith.constant 0 : index
    %32 = vector.load %arg8[%c40, %c0_26] : memref<72x256xf32, #tpu.memory_space<vmem>>, vector<8x256xf32>
    tpu.vector_store %arg8[%c40, %c0_26], %31 {strides = array<i32>} : memref<72x256xf32, #tpu.memory_space<vmem>>, vector<8x256xf32>,
    %c0_27 = arith.constant 0 : index
    %c32_28 = arith.constant 32 : index
    %33 = vector.load %arg0[%c0_27, %c32_28] : memref<8x290xf32, #tpu.memory_space<vmem>>, vector<8x256xf32>
    %c1_29 = arith.constant 1 : index
    %c0_30 = arith.constant 0 : index
    %34 = vector.load %arg1[%c1_29, %c0_30] : memref<4x256xf32, #tpu.memory_space<vmem>>, vector<1x256xf32>
    %35 = vector.broadcast %34 : vector<1x256xf32> to vector<8x256xf32>
    %36 = arith.mulf %33, %35 : vector<8x256xf32>
    %c2_31 = arith.constant 2 : index
    %c0_32 = arith.constant 0 : index
    %37 = vector.load %arg1[%c2_31, %c0_32] : memref<4x256xf32, #tpu.memory_space<vmem>>, vector<1x256xf32>
    %38 = vector.broadcast %37 : vector<1x256xf32> to vector<8x256xf32>
    %39 = arith.mulf %36, %38 : vector<8x256xf32>
    %c48 = arith.constant 48 : index
    %c0_33 = arith.constant 0 : index
    %40 = vector.load %arg8[%c48, %c0_33] : memref<72x256xf32, #tpu.memory_space<vmem>>, vector<8x256xf32>
    tpu.vector_store %arg8[%c48, %c0_33], %39 {strides = array<i32>} : memref<72x256xf32, #tpu.memory_space<vmem>>, vector<8x256xf32>,
    %c0_34 = arith.constant 0 : index
    %c33 = arith.constant 33 : index
    %41 = vector.load %arg0[%c0_34, %c33] : memref<8x290xf32, #tpu.memory_space<vmem>>, vector<8x256xf32>
    %c1_35 = arith.constant 1 : index
    %c0_36 = arith.constant 0 : index
    %42 = vector.load %arg1[%c1_35, %c0_36] : memref<4x256xf32, #tpu.memory_space<vmem>>, vector<1x256xf32>
    %43 = vector.broadcast %42 : vector<1x256xf32> to vector<8x256xf32>
    %44 = arith.mulf %41, %43 : vector<8x256xf32>
    %c56 = arith.constant 56 : index
    %c0_37 = arith.constant 0 : index
    %45 = vector.load %arg8[%c56, %c0_37] : memref<72x256xf32, #tpu.memory_space<vmem>>, vector<8x256xf32>
    tpu.vector_store %arg8[%c56, %c0_37], %44 {strides = array<i32>} : memref<72x256xf32, #tpu.memory_space<vmem>>, vector<8x256xf32>,
    %c0_38 = arith.constant 0 : index
    %c34 = arith.constant 34 : index
    %46 = vector.load %arg0[%c0_38, %c34] : memref<8x290xf32, #tpu.memory_space<vmem>>, vector<8x256xf32>
    %c1_39 = arith.constant 1 : index
    %c0_40 = arith.constant 0 : index
    %47 = vector.load %arg1[%c1_39, %c0_40] : memref<4x256xf32, #tpu.memory_space<vmem>>, vector<1x256xf32>
    %48 = vector.broadcast %47 : vector<1x256xf32> to vector<8x256xf32>
    %49 = arith.mulf %46, %48 : vector<8x256xf32>
    %c3_41 = arith.constant 3 : index
    %c0_42 = arith.constant 0 : index
    %50 = vector.load %arg1[%c3_41, %c0_42] : memref<4x256xf32, #tpu.memory_space<vmem>>, vector<1x256xf32>
    %51 = vector.broadcast %50 : vector<1x256xf32> to vector<8x256xf32>
    %52 = arith.mulf %49, %51 : vector<8x256xf32>
    %c64 = arith.constant 64 : index
    %c0_43 = arith.constant 0 : index
    %53 = vector.load %arg8[%c64, %c0_43] : memref<72x256xf32, #tpu.memory_space<vmem>>, vector<8x256xf32>
    tpu.vector_store %arg8[%c64, %c0_43], %52 {strides = array<i32>} : memref<72x256xf32, #tpu.memory_space<vmem>>, vector<8x256xf32>,
    %c0_44 = arith.constant 0 : index
    %c0_45 = arith.constant 0 : index
    %54 = vector.load %arg2[%c0_44, %c0_45] : memref<32x72xf32, #tpu.memory_space<vmem>>, vector<32x72xf32>
    %c0_46 = arith.constant 0 : index
    %c0_47 = arith.constant 0 : index
    %55 = vector.load %arg8[%c0_46, %c0_47] : memref<72x256xf32, #tpu.memory_space<vmem>>, vector<72x256xf32>
    %cst = arith.constant dense<0.000000e+00> : vector<32x256xf32>
    %56 = tpu.matmul %54, %55, %cst {dimension_numbers = #tpu.dot_dimension_numbers<[1], [0], [0], [1], [0, 0, 1, 1], [], []>} : vector<32x72xf32>, vector<72x256xf32>, vector<32x256xf32> -> vector<32x256xf32>
    %c0_48 = arith.constant 0 : index
    %c0_49 = arith.constant 0 : index
    %57 = vector.load %arg3[%c0_48, %c0_49] : memref<32x1xf32, #tpu.memory_space<vmem>>, vector<32x1xf32>
    %58 = vector.broadcast %57 : vector<32x1xf32> to vector<32x256xf32>
    %59 = arith.addf %56, %58 : vector<32x256xf32>
    %c0_50 = arith.constant 0 : index
    %c0_51 = arith.constant 0 : index
    %60 = vector.load %arg6[%c0_50, %c0_51] : memref<32x32xf32, #tpu.memory_space<vmem>>, vector<32x32xf32>
    %cst_52 = arith.constant dense<0.000000e+00> : vector<32x256xf32>
    %61 = tpu.matmul %60, %59, %cst_52 {dimension_numbers = #tpu.dot_dimension_numbers<[1], [0], [0], [1], [0, 0, 1, 1], [], []>} : vector<32x32xf32>, vector<32x256xf32>, vector<32x256xf32> -> vector<32x256xf32>
    %c0_53 = arith.constant 0 : index
    %c0_54 = arith.constant 0 : index
    %62 = vector.load %arg6[%c0_53, %c0_54] : memref<32x32xf32, #tpu.memory_space<vmem>>, vector<32x32xf32>
    %63 = arith.mulf %59, %59 : vector<32x256xf32>
    %cst_55 = arith.constant dense<0.000000e+00> : vector<32x256xf32>
    %64 = tpu.matmul %62, %63, %cst_55 {dimension_numbers = #tpu.dot_dimension_numbers<[1], [0], [0], [1], [0, 0, 1, 1], [], []>} : vector<32x32xf32>, vector<32x256xf32>, vector<32x256xf32> -> vector<32x256xf32>
    %cst_56 = arith.constant dense<0.000000e+00> : vector<32xf32>
    %65 = vector.multi_reduction <add>, %61, %cst_56 [1] : vector<32x256xf32> to vector<32xf32>
    %66 = vector.shape_cast %65 : vector<32xf32> to vector<32x1xf32>
    %cst_57 = arith.constant 4.8828125E-4 : f32
    %67 = vector.broadcast %cst_57 : f32 to vector<32x1xf32>
    %68 = arith.mulf %66, %67 : vector<32x1xf32>
    %cst_58 = arith.constant dense<0.000000e+00> : vector<32xf32>
    %69 = vector.multi_reduction <add>, %64, %cst_58 [1] : vector<32x256xf32> to vector<32xf32>
    %70 = vector.shape_cast %69 : vector<32xf32> to vector<32x1xf32>
    %cst_59 = arith.constant 4.8828125E-4 : f32
    %71 = vector.broadcast %cst_59 : f32 to vector<32x1xf32>
    %72 = arith.mulf %70, %71 : vector<32x1xf32>
    %73 = arith.mulf %68, %68 : vector<32x1xf32>
    %74 = arith.subf %72, %73 : vector<32x1xf32>
    %c0_60 = arith.constant 0 : index
    %c0_61 = arith.constant 0 : index
    %75 = vector.load %arg4[%c0_60, %c0_61] : memref<32x1xf32, #tpu.memory_space<vmem>>, vector<32x1xf32>
    %cst_62 = arith.constant 9.99999974E-6 : f32
    %76 = vector.broadcast %cst_62 : f32 to vector<32x1xf32>
    %77 = arith.addf %74, %76 : vector<32x1xf32>
    %78 = math.rsqrt %77 : vector<32x1xf32>
    %79 = arith.mulf %75, %78 : vector<32x1xf32>
    %c0_63 = arith.constant 0 : index
    %c0_64 = arith.constant 0 : index
    %80 = vector.load %arg5[%c0_63, %c0_64] : memref<32x1xf32, #tpu.memory_space<vmem>>, vector<32x1xf32>
    %81 = arith.mulf %68, %79 : vector<32x1xf32>
    %82 = arith.subf %80, %81 : vector<32x1xf32>
    %83 = vector.broadcast %79 : vector<32x1xf32> to vector<32x256xf32>
    %84 = arith.mulf %59, %83 : vector<32x256xf32>
    %85 = vector.broadcast %82 : vector<32x1xf32> to vector<32x256xf32>
    %86 = arith.addf %84, %85 : vector<32x256xf32>
    %cst_65 = arith.constant 0.000000e+00 : f32
    %87 = vector.broadcast %cst_65 : f32 to vector<32x256xf32>
    %88 = arith.cmpf oge, %86, %87 : vector<32x256xf32>
    %cst_66 = arith.constant 2.000000e-01 : f32
    %89 = vector.broadcast %cst_66 : f32 to vector<32x256xf32>
    %90 = arith.mulf %89, %86 : vector<32x256xf32>
    %91 = arith.select %88, %86, %90 : vector<32x256xi1>, vector<32x256xf32>
    %c0_67 = arith.constant 0 : index
    %c0_68 = arith.constant 0 : index
    %92 = vector.load %arg7[%c0_67, %c0_68] : memref<32x256xf32, #tpu.memory_space<vmem>>, vector<32x256xf32>
    tpu.vector_store %arg7[%c0_67, %c0_68], %91 {strides = array<i32>} : memref<32x256xf32, #tpu.memory_space<vmem>>, vector<32x256xf32>,
    return
  }
}

</mosaic_0001>

<bundles_post_ra>
// kernel: tile.19
= control target key start
LH: loop header
LB: loop body
LE: loop exit
PB: predicated region body
PF: predicated region fallthrough
CT: control target
= control target key end

     0   :  { %s22_s0 = inlined_call_operand.vmem [shape: f32[4], index: 0, kind: input, shape index: {}]   ;;  %s23_s1 = inlined_call_operand.vmem [shape: f32[8,1,1,4], index: 1, kind: output, shape index: {}]  }
   0x1   :  { %v4_v0 = vld [vmem:[%s22_s0] ss:$0 sm:$0xff] }
   0x2   :  { %5 = vst [vmem:[%s23_s1] sm:$0xff] %v4_v0 }

// kernel: tile.1
= control target key start
LH: loop header
LB: loop body
LE: loop exit
PB: predicated region body
PF: predicated region fallthrough
CT: control target
= control target key end

     0   :  { %vm3_vm0 = vcmask 7168   ;;  %s30_s8 = smov 125   ;;  %s31_s11 = smov 126   ;;  %s57_s0 = inlined_call_operand.vmem [shape: f32[8,1,1,4], index: 0, kind: input, shape index: {}]   ;;  %s58_s1 = inlined_call_operand.vmem [shape: f32[32,1], index: 1, kind: output, shape index: {}]  }
   0x1   :  { %v5_v0 = vld [vmem:[%s57_s0] sm:$0xff]   ;;  %s29_s0 = smov 127  }
   0x2   :  { %6 = vrot.lane.b32.xlu0 %v5_v0, %s29_s0  ;;  %18 = vrot.lane.b32.xlu1 %v5_v0, %s30_s8  ;;  %4 = vst.msk [vmem:[%s58_s1] ss:$4 sm:$0xff] %vm3_vm0, %v5_v0  }
   0x6   :  { %12 = vrot.lane.b32.xlu0 %v5_v0, %s31_s11 }
  0x74   :  { %v7_v1 = vpop.permute.xlu0 %6   ;;  %v19_v2 = vpop.permute.xlu1 %18  }
  0x75   :  { %23 = vst.msk [vmem:[%s58_s1 + $0x1] ss:$4 sm:$0xff] %vm3_vm0, %v7_v1   ;;  %25 = vst.msk [vmem:[%s58_s1 + $0x3] ss:$4 sm:$0xff] %vm3_vm0, %v19_v2  }
  0x78   :  { %v13_v3 = vpop.permute.xlu0 %12  }
  0x79   :  { %24 = vst.msk [vmem:[%s58_s1 + $0x2] ss:$4 sm:$0xff] %vm3_vm0, %v13_v3  }

// kernel: tile.32
= control target key start
LH: loop header
LB: loop body
LE: loop exit
PB: predicated region body
PF: predicated region fallthrough
CT: control target
= control target key end

     0   :  { %s226_s0 = inlined_call_operand.vmem [shape: f32[4,4], index: 0, kind: input, shape index: {}]   ;;  %s227_s1 = inlined_call_operand.vmem [shape: f32[8,4,8,4], index: 1, kind: output, shape index: {}]  }
   0x1   :  { %v4_v0 = vld [vmem:[%s226_s0] ss:$0 sm:$0xff]  ;;  %v81_v1 = vld [vmem:[%s226_s0 + $0x1] ss:$0 sm:$0xff]  ;;  %v90_v2 = vld [vmem:[%s226_s0 + $0x2] ss:$0 sm:$0xff] }
   0x2   :  { %5 = vst [vmem:[%s227_s1] sm:$0xff] %v4_v0  ;;  %74 = vst [vmem:[%s227_s1 + $0x20] sm:$0xff] %v4_v0  ;;  %v99_v3 = vld [vmem:[%s226_s0 + $0x3] ss:$0 sm:$0xff] }
   0x3   :  { %75 = vst [vmem:[%s227_s1 + $0x40] sm:$0xff] %v4_v0  ;;  %76 = vst [vmem:[%s227_s1 + $0x60] sm:$0xff] %v4_v0 }
   0x4   :  { %77 = vst [vmem:[%s227_s1 + $0x80] sm:$0xff] %v4_v0  ;;  %78 = vst [vmem:[%s227_s1 + $0xa0] sm:$0xff] %v4_v0 }
   0x5   :  { %79 = vst [vmem:[%s227_s1 + $0xc0] sm:$0xff] %v4_v0  ;;  %80 = vst [vmem:[%s227_s1 + $0xe0] sm:$0xff] %v4_v0 }
   0x6   :  { %82 = vst [vmem:[%s227_s1 + $0x8] sm:$0xff] %v81_v1  ;;  %83 = vst [vmem:[%s227_s1 + $0x28] sm:$0xff] %v81_v1 }
   0x7   :  { %84 = vst [vmem:[%s227_s1 + $0x48] sm:$0xff] %v81_v1  ;;  %85 = vst [vmem:[%s227_s1 + $0x68] sm:$0xff] %v81_v1 }
   0x8   :  { %86 = vst [vmem:[%s227_s1 + $0x88] sm:$0xff] %v81_v1  ;;  %87 = vst [vmem:[%s227_s1 + $0xa8] sm:$0xff] %v81_v1 }
   0x9   :  { %88 = vst [vmem:[%s227_s1 + $0xc8] sm:$0xff] %v81_v1  ;;  %89 = vst [vmem:[%s227_s1 + $0xe8] sm:$0xff] %v81_v1 }
   0xa   :  { %91 = vst [vmem:[%s227_s1 + $0x10] sm:$0xff] %v90_v2  ;;  %92 = vst [vmem:[%s227_s1 + $0x30] sm:$0xff] %v90_v2 }
   0xb   :  { %93 = vst [vmem:[%s227_s1 + $0x50] sm:$0xff] %v90_v2  ;;  %94 = vst [vmem:[%s227_s1 + $0x70] sm:$0xff] %v90_v2 }
   0xc   :  { %95 = vst [vmem:[%s227_s1 + $0x90] sm:$0xff] %v90_v2  ;;  %96 = vst [vmem:[%s227_s1 + $0xb0] sm:$0xff] %v90_v2 }
   0xd   :  { %97 = vst [vmem:[%s227_s1 + $0xd0] sm:$0xff] %v90_v2  ;;  %98 = vst [vmem:[%s227_s1 + $0xf0] sm:$0xff] %v90_v2 }
   0xe   :  { %100 = vst [vmem:[%s227_s1 + $0x18] sm:$0xff] %v99_v3  ;;  %101 = vst [vmem:[%s227_s1 + $0x38] sm:$0xff] %v99_v3 }
   0xf   :  { %102 = vst [vmem:[%s227_s1 + $0x58] sm:$0xff] %v99_v3  ;;  %103 = vst [vmem:[%s227_s1 + $0x78] sm:$0xff] %v99_v3 }
  0x10   :  { %104 = vst [vmem:[%s227_s1 + $0x98] sm:$0xff] %v99_v3  ;;  %105 = vst [vmem:[%s227_s1 + $0xb8] sm:$0xff] %v99_v3 }
  0x11   :  { %106 = vst [vmem:[%s227_s1 + $0xd8] sm:$0xff] %v99_v3  ;;  %107 = vst [vmem:[%s227_s1 + $0xf8] sm:$0xff] %v99_v3 }

// kernel: tile.33
= control target key start
LH: loop header
LB: loop body
LE: loop exit
PB: predicated region body
PF: predicated region fallthrough
CT: control target
= control target key end

     0   :  { %vm4_vm0 = vcmask 1047556   ;;  %s429_s14 = smov 28   ;;  %s430_s10 = smov 24   ;;  %vm6_vm1 = vcmask 31744   ;;  %vm43_vm2 = vcmask 261344   ;;  %vm86_vm3 = vcmask 228544   ;;  %s770_s0 = inlined_call_operand.vmem [shape: f32[8,4,8,4], index: 0, kind: input, shape index: {}]   ;;  %s771_s1 = inlined_call_operand.vmem [shape: f32[32,32], index: 1, kind: output, shape index: {}]  }
   0x1   :  { %v350_v0 = vld [vmem:[%s770_s0 + $0x87] ss:$8 sm:$0xf]   ;;  %v358_v12 = vld [vmem:[%s770_s0 + $0x46] ss:$8 sm:$0xf]  }
   0x2   :  { %v351_v1 = vld [vmem:[%s770_s0 + $0x87] ss:$8 sm:$0xf0]   ;;  %v359_v13 = vld [vmem:[%s770_s0 + $0x46] ss:$8 sm:$0xf0]  }
   0x3   :  { %v61_v2 = vsel %vm4_vm0, %v351_v1, %v350_v0  ;;  %v345_v3 = vld [vmem:[%s770_s0 + $0x7] ss:$8 sm:$0xf]   ;;  %v356_v14 = vld [vmem:[%s770_s0 + $0x6] ss:$8 sm:$0xf]   ;;  %v93_v16 = vsel %vm4_vm0, %v359_v13, %v358_v12 }
   0x4   :  { %v346_v4 = vld [vmem:[%s770_s0 + $0x7] ss:$8 sm:$0xf0]   ;;  %62 = vrot.lane.b32.xlu1 %v61_v2, %s429_s14  ;;  %v357_v15 = vld [vmem:[%s770_s0 + $0x6] ss:$8 sm:$0xf0]  }
   0x5   :  { %v40_v5 = vsel %vm4_vm0, %v346_v4, %v345_v3  ;;  %v353_v6 = vld [vmem:[%s770_s0 + $0xc7] ss:$8 sm:$0xf]   ;;  %v83_v17 = vsel %vm4_vm0, %v357_v15, %v356_v14  ;;  %v364_v18 = vld [vmem:[%s770_s0 + $0xc6] ss:$8 sm:$0xf]  }
   0x6   :  { %v354_v7 = vld [vmem:[%s770_s0 + $0xc7] ss:$8 sm:$0xf0]   ;;  %41 = vrot.lane.b32.xlu0 %v40_v5, %s429_s14  ;;  %v365_v19 = vld [vmem:[%s770_s0 + $0xc6] ss:$8 sm:$0xf0]  }
   0x7   :  { %v72_v8 = vsel %vm4_vm0, %v354_v7, %v353_v6  ;;  %v347_v9 = vld [vmem:[%s770_s0 + $0x47] ss:$8 sm:$0xf]   ;;  %v361_v20 = vld [vmem:[%s770_s0 + $0x86] ss:$8 sm:$0xf]   ;;  %v115_v22 = vsel %vm4_vm0, %v365_v19, %v364_v18 }
   0x8   :  { %v348_v10 = vld [vmem:[%s770_s0 + $0x47] ss:$8 sm:$0xf0]   ;;  %73 = vrot.lane.b32.xlu1 %v72_v8, %s429_s14  ;;  %v362_v21 = vld [vmem:[%s770_s0 + $0x86] ss:$8 sm:$0xf0]  }
   0x9   :  { %v50_v11 = vsel %vm4_vm0, %v348_v10, %v347_v9  ;;  %v104_v23 = vsel %vm4_vm0, %v362_v21, %v361_v20  ;;  %v369_v24 = vld [vmem:[%s770_s0 + $0x45] ss:$8 sm:$0xf]   ;;  %s431_s27 = smov 20   ;;  %s432_s15 = smov 16   ;;  %vm129_vm4 = vcmask 195744  }
   0xa   :  { %51 = vrot.lane.b32.xlu0 %v50_v11, %s429_s14  ;;  %v370_v25 = vld [vmem:[%s770_s0 + $0x45] ss:$8 sm:$0xf0]   ;;  %v380_v36 = vld [vmem:[%s770_s0 + $0x44] ss:$8 sm:$0xf]  }
   0xb   :  { %v367_v26 = vld [vmem:[%s770_s0 + $0x5] ss:$8 sm:$0xf]   ;;  %v136_v28 = vsel %vm4_vm0, %v370_v25, %v369_v24  ;;  %v381_v37 = vld [vmem:[%s770_s0 + $0x44] ss:$8 sm:$0xf0]  }
   0xc   :  { %94 = vrot.lane.b32.xlu1 %v93_v16, %s430_s10  ;;  %v368_v27 = vld [vmem:[%s770_s0 + $0x5] ss:$8 sm:$0xf0]   ;;  %v378_v38 = vld [vmem:[%s770_s0 + $0x4] ss:$8 sm:$0xf]   ;;  %v179_v40 = vsel %vm4_vm0, %v381_v37, %v380_v36 }
   0xd   :  { %v126_v29 = vsel %vm4_vm0, %v368_v27, %v367_v26  ;;  %v375_v30 = vld [vmem:[%s770_s0 + $0xc5] ss:$8 sm:$0xf]   ;;  %v379_v39 = vld [vmem:[%s770_s0 + $0x4] ss:$8 sm:$0xf0]  }
   0xe   :  { %84 = vrot.lane.b32.xlu0 %v83_v17, %s430_s10  ;;  %v376_v31 = vld [vmem:[%s770_s0 + $0xc5] ss:$8 sm:$0xf0]   ;;  %v169_v41 = vsel %vm4_vm0, %v379_v39, %v378_v38  ;;  %v386_v42 = vld [vmem:[%s770_s0 + $0xc4] ss:$8 sm:$0xf]  }
   0xf   :  { %v372_v32 = vld [vmem:[%s770_s0 + $0x85] ss:$8 sm:$0xf]   ;;  %v158_v34 = vsel %vm4_vm0, %v376_v31, %v375_v30  ;;  %v387_v43 = vld [vmem:[%s770_s0 + $0xc4] ss:$8 sm:$0xf0]  }
  0x10   :  { %116 = vrot.lane.b32.xlu1 %v115_v22, %s430_s10  ;;  %v373_v33 = vld [vmem:[%s770_s0 + $0x85] ss:$8 sm:$0xf0]   ;;  %v383_v44 = vld [vmem:[%s770_s0 + $0x84] ss:$8 sm:$0xf]   ;;  %v201_v46 = vsel %vm4_vm0, %v387_v43, %v386_v42 }
  0x11   :  { %v147_v35 = vsel %vm4_vm0, %v373_v33, %v372_v32  ;;  %v384_v45 = vld [vmem:[%s770_s0 + $0x84] ss:$8 sm:$0xf0]   ;;  %v391_v47 = vld [vmem:[%s770_s0 + $0x43] ss:$8 sm:$0xf]  }
  0x12   :  { %105 = vrot.lane.b32.xlu0 %v104_v23, %s430_s10  ;;  %v190_v48 = vsel %vm4_vm0, %v384_v45, %v383_v44  ;;  %v392_v49 = vld [vmem:[%s770_s0 + $0x43] ss:$8 sm:$0xf0]   ;;  %v339_v52 = vld [vmem:[%s770_s0 + $0x80] ss:$8 sm:$0xf]  }
  0x13   :  { %v389_v50 = vld [vmem:[%s770_s0 + $0x3] ss:$8 sm:$0xf]   ;;  %v340_v55 = vld [vmem:[%s770_s0 + $0x80] ss:$8 sm:$0xf0]   ;;  %v222_v57 = vsel %vm4_vm0, %v392_v49, %v391_v47 }
  0x14   :  { %137 = vrot.lane.b32.xlu1 %v136_v28, %s431_s27  ;;  %v390_v51 = vld [vmem:[%s770_s0 + $0x3] ss:$8 sm:$0xf0]   ;;  %v2_v56 = vld [vmem:[%s770_s0] ss:$8 sm:$0xf]   ;;  %v22_v59 = vsel %vm4_vm0, %v340_v55, %v339_v52 }
  0x15   :  { %v397_v53 = vld [vmem:[%s770_s0 + $0xc3] ss:$8 sm:$0xf]   ;;  %v3_v60 = vld [vmem:[%s770_s0] ss:$8 sm:$0xf0]   ;;  %v212_v62 = vsel %vm4_vm0, %v390_v51, %v389_v50 }
  0x16   :  { %127 = vrot.lane.b32.xlu0 %v126_v29, %s431_s27  ;;  %v398_v54 = vld [vmem:[%s770_s0 + $0xc3] ss:$8 sm:$0xf0]   ;;  %v342_v61 = vld [vmem:[%s770_s0 + $0xc0] ss:$8 sm:$0xf]   ;;  %v5_v63 = vsel %vm4_vm0, %v3_v60, %v2_v56 }
  0x17   :  { %v394_v58 = vld [vmem:[%s770_s0 + $0x83] ss:$8 sm:$0xf]   ;;  %341 = vst.msk [vmem:[%s771_s1 + $0x10] sm:$0xff] %vm6_vm1, %v22_v59   ;;  %7 = vst.msk [vmem:[%s771_s1] sm:$0xff] %vm6_vm1, %v5_v63   ;;  %s433_s23 = smov 12   ;;  %v244_v6 = vsel %vm4_vm0, %v398_v54, %v397_v53 }
  0x18   :  { %159 = vrot.lane.b32.xlu1 %v158_v34, %s431_s27  ;;  %v343_v0 = vld [vmem:[%s770_s0 + $0xc0] ss:$8 sm:$0xf0]   ;;  %v395_v2 = vld [vmem:[%s770_s0 + $0x83] ss:$8 sm:$0xf0]  }
  0x19   :  { %v336_v1 = vld [vmem:[%s770_s0 + $0x40] ss:$8 sm:$0xf]   ;;  %v31_v3 = vsel %vm4_vm0, %v343_v0, %v342_v61  ;;  %v233_v7 = vsel %vm4_vm0, %v395_v2, %v394_v58  ;;  %v402_v8 = vld [vmem:[%s770_s0 + $0x42] ss:$8 sm:$0xf]  }
  0x1a   :  { %148 = vrot.lane.b32.xlu0 %v147_v35, %s431_s27  ;;  %v337_v4 = vld [vmem:[%s770_s0 + $0x40] ss:$8 sm:$0xf0]   ;;  %344 = vst.msk [vmem:[%s771_s1 + $0x18] sm:$0xff] %vm6_vm1, %v31_v3   ;;  %vm172_vm5 = vcmask 162944   ;;  %vm215_vm6 = vcmask 130144  }
  0x1b   :  { %v13_v5 = vsel %vm4_vm0, %v337_v4, %v336_v1  ;;  %v403_v9 = vld [vmem:[%s770_s0 + $0x42] ss:$8 sm:$0xf0]   ;;  %v413_v20 = vld [vmem:[%s770_s0 + $0x41] ss:$8 sm:$0xf]  }
  0x1c   :  { %180 = vrot.lane.b32.xlu1 %v179_v40, %s432_s15  ;;  %338 = vst.msk [vmem:[%s771_s1 + $0x8] sm:$0xff] %vm6_vm1, %v13_v5   ;;  %v400_v10 = vld [vmem:[%s770_s0 + $0x2] ss:$8 sm:$0xf]   ;;  %v265_v12 = vsel %vm4_vm0, %v403_v9, %v402_v8  ;;  %vm258_vm7 = vcmask 97344   ;;  %vm301_vm8 = vcmask 64544  }
  0x1d   :  { %v401_v11 = vld [vmem:[%s770_s0 + $0x2] ss:$8 sm:$0xf0]   ;;  %v414_v21 = vld [vmem:[%s770_s0 + $0x41] ss:$8 sm:$0xf0]  }
  0x1e   :  { %170 = vrot.lane.b32.xlu0 %v169_v41, %s432_s15  ;;  %v255_v13 = vsel %vm4_vm0, %v401_v11, %v400_v10  ;;  %v408_v14 = vld [vmem:[%s770_s0 + $0xc2] ss:$8 sm:$0xf]   ;;  %v411_v22 = vld [vmem:[%s770_s0 + $0x1] ss:$8 sm:$0xf]   ;;  %v308_v24 = vsel %vm4_vm0, %v414_v21, %v413_v20 }
  0x1f   :  { %v409_v15 = vld [vmem:[%s770_s0 + $0xc2] ss:$8 sm:$0xf0]   ;;  %v412_v23 = vld [vmem:[%s770_s0 + $0x1] ss:$8 sm:$0xf0]  }
  0x20   :  { %202 = vrot.lane.b32.xlu1 %v201_v46, %s432_s15  ;;  %v405_v16 = vld [vmem:[%s770_s0 + $0x82] ss:$8 sm:$0xf]   ;;  %v287_v18 = vsel %vm4_vm0, %v409_v15, %v408_v14  ;;  %v298_v25 = vsel %vm4_vm0, %v412_v23, %v411_v22  ;;  %v419_v26 = vld [vmem:[%s770_s0 + $0xc1] ss:$8 sm:$0xf]  }
  0x21   :  { %v406_v17 = vld [vmem:[%s770_s0 + $0x82] ss:$8 sm:$0xf0]   ;;  %v420_v27 = vld [vmem:[%s770_s0 + $0xc1] ss:$8 sm:$0xf0]  }
  0x22   :  { %191 = vrot.lane.b32.xlu0 %v190_v48, %s432_s15  ;;  %s434_s15 = smov 8   ;;  %v276_v19 = vsel %vm4_vm0, %v406_v17, %v405_v16  ;;  %v416_v28 = vld [vmem:[%s770_s0 + $0x81] ss:$8 sm:$0xf]   ;;  %v330_v30 = vsel %vm4_vm0, %v420_v27, %v419_v26 }
  0x23   :  { %v417_v29 = vld [vmem:[%s770_s0 + $0x81] ss:$8 sm:$0xf0]   ;;  %s435_s0 = smov 4  }
  0x24   :  { %223 = vrot.lane.b32.xlu1 %v222_v57, %s433_s23  ;;  %v319_v31 = vsel %vm4_vm0, %v417_v29, %v416_v28 }
  0x26   :  { %213 = vrot.lane.b32.xlu0 %v212_v62, %s433_s23 }
  0x28   :  { %245 = vrot.lane.b32.xlu1 %v244_v6, %s433_s23 }
  0x2a   :  { %234 = vrot.lane.b32.xlu0 %v233_v7, %s433_s23 }
  0x2c   :  { %266 = vrot.lane.b32.xlu1 %v265_v12, %s434_s15 }
  0x2e   :  { %256 = vrot.lane.b32.xlu0 %v255_v13, %s434_s15 }
  0x30   :  { %288 = vrot.lane.b32.xlu1 %v287_v18, %s434_s15 }
  0x32   :  { %277 = vrot.lane.b32.xlu0 %v276_v19, %s434_s15 }
  0x34   :  { %309 = vrot.lane.b32.xlu1 %v308_v24, %s435_s0 }
  0x36   :  { %299 = vrot.lane.b32.xlu0 %v298_v25, %s435_s0 }
  0x38   :  { %331 = vrot.lane.b32.xlu1 %v330_v30, %s435_s0 }
  0x3a   :  { %320 = vrot.lane.b32.xlu0 %v319_v31, %s435_s0 }
  0x76   :  { %v63_v32 = vpop.permute.xlu1 %62  }
  0x77   :  { %352 = vst.msk [vmem:[%s771_s1 + $0x10] sm:$0xff] %vm43_vm2, %v63_v32  }
  0x78   :  { %v42_v33 = vpop.permute.xlu0 %41  }
  0x79   :  { %44 = vst.msk [vmem:[%s771_s1] sm:$0xff] %vm43_vm2, %v42_v33  }
  0x7a   :  { %v74_v34 = vpop.permute.xlu1 %73  }
  0x7b   :  { %355 = vst.msk [vmem:[%s771_s1 + $0x18] sm:$0xff] %vm43_vm2, %v74_v34  }
  0x7c   :  { %v52_v35 = vpop.permute.xlu0 %51  }
  0x7d   :  { %349 = vst.msk [vmem:[%s771_s1 + $0x8] sm:$0xff] %vm43_vm2, %v52_v35  }
  0x7e   :  { %v95_v36 = vpop.permute.xlu1 %94  }
  0x7f   :  { %360 = vst.msk [vmem:[%s771_s1 + $0x8] sm:$0xff] %vm86_vm3, %v95_v36  }
  0x80   :  { %v85_v37 = vpop.permute.xlu0 %84  }
  0x81   :  { %87 = vst.msk [vmem:[%s771_s1] sm:$0xff] %vm86_vm3, %v85_v37  }
  0x82   :  { %v117_v38 = vpop.permute.xlu1 %116  }
  0x83   :  { %366 = vst.msk [vmem:[%s771_s1 + $0x18] sm:$0xff] %vm86_vm3, %v117_v38  }
  0x84   :  { %v106_v39 = vpop.permute.xlu0 %105  }
  0x85   :  { %363 = vst.msk [vmem:[%s771_s1 + $0x10] sm:$0xff] %vm86_vm3, %v106_v39  }
  0x86   :  { %v138_v40 = vpop.permute.xlu1 %137  }
  0x87   :  { %371 = vst.msk [vmem:[%s771_s1 + $0x8] sm:$0xff] %vm129_vm4, %v138_v40  }
  0x88   :  { %v128_v41 = vpop.permute.xlu0 %127  }
  0x89   :  { %130 = vst.msk [vmem:[%s771_s1] sm:$0xff] %vm129_vm4, %v128_v41  }
  0x8a   :  { %v160_v42 = vpop.permute.xlu1 %159  }
  0x8b   :  { %377 = vst.msk [vmem:[%s771_s1 + $0x18] sm:$0xff] %vm129_vm4, %v160_v42  }
  0x8c   :  { %v149_v43 = vpop.permute.xlu0 %148  }
  0x8d   :  { %374 = vst.msk [vmem:[%s771_s1 + $0x10] sm:$0xff] %vm129_vm4, %v149_v43  }
  0x8e   :  { %v181_v44 = vpop.permute.xlu1 %180  }
  0x8f   :  { %382 = vst.msk [vmem:[%s771_s1 + $0x8] sm:$0xff] %vm172_vm5, %v181_v44  }
  0x90   :  { %v171_v45 = vpop.permute.xlu0 %170  }
  0x91   :  { %173 = vst.msk [vmem:[%s771_s1] sm:$0xff] %vm172_vm5, %v171_v45  }
  0x92   :  { %v203_v46 = vpop.permute.xlu1 %202  }
  0x93   :  { %388 = vst.msk [vmem:[%s771_s1 + $0x18] sm:$0xff] %vm172_vm5, %v203_v46  }
  0x94   :  { %v192_v47 = vpop.permute.xlu0 %191  }
  0x95   :  { %385 = vst.msk [vmem:[%s771_s1 + $0x10] sm:$0xff] %vm172_vm5, %v192_v47  }
  0x96   :  { %v224_v48 = vpop.permute.xlu1 %223  }
  0x97   :  { %393 = vst.msk [vmem:[%s771_s1 + $0x8] sm:$0xff] %vm215_vm6, %v224_v48  }
  0x98   :  { %v214_v49 = vpop.permute.xlu0 %213  }
  0x99   :  { %216 = vst.msk [vmem:[%s771_s1] sm:$0xff] %vm215_vm6, %v214_v49  }
  0x9a   :  { %v246_v50 = vpop.permute.xlu1 %245  }
  0x9b   :  { %399 = vst.msk [vmem:[%s771_s1 + $0x18] sm:$0xff] %vm215_vm6, %v246_v50  }
  0x9c   :  { %v235_v51 = vpop.permute.xlu0 %234  }
  0x9d   :  { %396 = vst.msk [vmem:[%s771_s1 + $0x10] sm:$0xff] %vm215_vm6, %v235_v51  }
  0x9e   :  { %v267_v52 = vpop.permute.xlu1 %266  }
  0x9f   :  { %404 = vst.msk [vmem:[%s771_s1 + $0x8] sm:$0xff] %vm258_vm7, %v267_v52  }
  0xa0   :  { %v257_v53 = vpop.permute.xlu0 %256  }
  0xa1   :  { %259 = vst.msk [vmem:[%s771_s1] sm:$0xff] %vm258_vm7, %v257_v53  }
  0xa2   :  { %v289_v54 = vpop.permute.xlu1 %288  }
  0xa3   :  { %410 = vst.msk [vmem:[%s771_s1 + $0x18] sm:$0xff] %vm258_vm7, %v289_v54  }
  0xa4   :  { %v278_v55 = vpop.permute.xlu0 %277  }
  0xa5   :  { %407 = vst.msk [vmem:[%s771_s1 + $0x10] sm:$0xff] %vm258_vm7, %v278_v55  }
  0xa6   :  { %v310_v56 = vpop.permute.xlu1 %309  }
  0xa7   :  { %415 = vst.msk [vmem:[%s771_s1 + $0x8] sm:$0xff] %vm301_vm8, %v310_v56  }
  0xa8   :  { %v300_v57 = vpop.permute.xlu0 %299  }
  0xa9   :  { %302 = vst.msk [vmem:[%s771_s1] sm:$0xff] %vm301_vm8, %v300_v57  }
  0xaa   :  { %v332_v58 = vpop.permute.xlu1 %331  }
  0xab   :  { %421 = vst.msk [vmem:[%s771_s1 + $0x18] sm:$0xff] %vm301_vm8, %v332_v58  }
  0xac   :  { %v321_v59 = vpop.permute.xlu0 %320  }
  0xad   :  { %418 = vst.msk [vmem:[%s771_s1 + $0x10] sm:$0xff] %vm301_vm8, %v321_v59  }

// kernel: up_forward.1
= control target key start
LH: loop header
LB: loop body
LE: loop exit
PB: predicated region body
PF: predicated region fallthrough
CT: control target
= control target key end

     0   :  { %v30_v0 = vlaneseq  ;;  %s1055_s28 = smov 2   ;;  %s1056_s29 = smov 1   ;;  %vm76_vm0 = vcmask 7168   ;;  %vm117_vm1 = vcmask 15360   ;;  %vm180_vm2 = vcmask 130048   ;;  %s1371_s1 = inlined_call_operand.vmem [shape: f32[4,256], index: 1, kind: input, shape index: {}]   ;;  %s1372_s0 = inlined_call_operand.vmem [shape: f32[8,290], index: 0, kind: input, shape index: {}]   ;;  %s1373_s3 = inlined_call_operand.vmem [shape: f32[32,1], index: 3, kind: input, shape index: {}]   ;;  %s1374_s2 = inlined_call_operand.vmem [shape: f32[32,72], index: 2, kind: input, shape index: {}]   ;;  %s1375_s6 = inlined_call_operand.vmem [shape: f32[32,32], index: 6, kind: input, shape index: {}]   ;;  %s1376_s4 = inlined_call_operand.vmem [shape: f32[32,1], index: 4, kind: input, shape index: {}]   ;;  %s1377_s5 = inlined_call_operand.vmem [shape: f32[32,1], index: 5, kind: input, shape index: {}]   ;;  %s1378_s7 = inlined_call_operand.vmem [shape: f32[32,256], index: 7, kind: output, shape index: {}]  }
   0x1   :  { %v103_v2 = vld [vmem:[%s1371_s1] ss:$4 sm:$0x3]  ;;  %v941_v10 = vld [vmem:[%s1371_s1 + $0x3] ss:$4 sm:$0x3] }
   0x2   :  { %v31_v1 = vshrl.u32 %v30_v0, 7  ;;  %v62_v3 = vld [vmem:[%s1371_s1] ss:$4 sm:$0x3]  ;;  %s1057_s13 = smov 16   ;;  %s1058_s16 = smov 18  }
   0x3   :  { %v942_v13 = vld [vmem:[%s1371_s1 + $0x2] ss:$4 sm:$0x3]  ;;  %v943_v16 = vld [vmem:[%s1371_s1 + $0x3] ss:$4 sm:$0x3] }
   0x4   :  { %v1118_v4 = vsub.s32 0, %v31_v1  ;;  %v1120_v5 = vsub.s32 1, %v31_v1  ;;  %v944_v19 = vld [vmem:[%s1371_s1 + $0x1] ss:$4 sm:$0x3]  ;;  %s1059_s19 = smov 32  }
   0x5   :  { %v945_v22 = vld [vmem:[%s1371_s1 + $0x2] ss:$4 sm:$0x3]  ;;  %v946_v25 = vld [vmem:[%s1371_s1 + $0x1] ss:$4 sm:$0x3] }
   0x6   :  { %v108_v6 = vrot.slane %v103_v2, %v1118_v4  ;;  %v67_v7 = vrot.slane %v62_v3, %v1118_v4  ;;  %v112_v8 = vrot.slane %v103_v2, %v1120_v5  ;;  %v71_v9 = vrot.slane %v62_v3, %v1120_v5  ;;  %v947_v28 = vld [vmem:[%s1371_s1 + $0x1] ss:$4 sm:$0x3]  ;;  %s1060_s24 = smov 33   ;;  %s1061_s27 = smov 34   ;;  %v1169_v34 = vld [vmem:[%s1372_s0 + $0x8] sm:$0xff] }
   0x7   :  { %v135_v11 = vrot.slane %v941_v10, %v1120_v5  ;;  %v131_v12 = vrot.slane %v941_v10, %v1118_v4  ;;  %v175_v14 = vrot.slane %v942_v13, %v1120_v5  ;;  %v171_v15 = vrot.slane %v942_v13, %v1118_v4  ;;  %v948_v31 = vld [vmem:[%s1371_s1 + $0x3] ss:$4 sm:$0x3]  ;;  %v1174_v35 = vld [vmem:[%s1372_s0 + $0x10] sm:$0xff]  ;;  %s1062_s9 = smov 111   ;;  %s1063_s12 = smov 127  }
   0x8   :  { %113 = vrot.lane.b32.xlu1 %v108_v6, %s1055_s28  ;;  %72 = vrot.lane.b32.xlu0 %v67_v7, %s1056_s29  ;;  %v235_v17 = vrot.slane %v943_v16, %v1120_v5  ;;  %v231_v18 = vrot.slane %v943_v16, %v1118_v4  ;;  %v277_v20 = vrot.slane %v944_v19, %v1120_v5  ;;  %v1181_v37 = vld [vmem:[%s1372_s0] sm:$0xff]  ;;  %s1064_s0 = smov 126   ;;  %vm240_vm3 = vcmask 146432   ;;  %s1066_s14 = smov 110  }
   0x9   :  { %v273_v21 = vrot.slane %v944_v19, %v1118_v4  ;;  %v299_v23 = vrot.slane %v945_v22, %v1120_v5  ;;  %v295_v24 = vrot.slane %v945_v22, %v1118_v4  ;;  %v339_v26 = vrot.slane %v946_v25, %v1120_v5  ;;  %s1067_s15 = smov 96   ;;  %s1070_s17 = smov 94  }
   0xa   :  { %v335_v27 = vrot.slane %v946_v25, %v1118_v4  ;;  %v380_v29 = vrot.slane %v947_v28, %v1120_v5  ;;  %v376_v30 = vrot.slane %v947_v28, %v1118_v4  ;;  %v402_v32 = vrot.slane %v948_v31, %v1120_v5 }
   0xb   :  { %v398_v33 = vrot.slane %v948_v31, %v1118_v4  ;;  %v1010_v36 = vpack.i.bf16 %v1174_v35, %v1169_v34  ;;  %vm282_vm4 = vcmask 261120   ;;  %vm344_vm5 = vcmask 269312  }
   0xc   :  { %115 = vrot.lane.b32.xlu1 %v112_v8, %s1055_s28  ;;  %74 = vrot.lane.b32.xlu0 %v71_v9, %s1056_s29  ;;  %vm385_vm6 = vcmask 277504   ;;  %v1068_v31 = vmov 0.0   ;;  %vm93_vm7 = vcmask 1039360   ;;  %vm156_vm8 = vcmask 1031168  }
   0xd   :  { %553 = vmatprep.mubr.f32.mxu0 %v1068_v31  ;;  %658 = vmatprep.mubr.f32.mxu1 %v1068_v31  ;;  %vm197_vm9 = vcmask 916480   ;;  %vm216_vm10 = vcmask 908288   ;;  %vm257_vm11 = vcmask 900096   ;;  %vm320_vm12 = vcmask 785408  }
   0xe   :  { %vm361_vm13 = vcmask 777216   ;;  %vm423_vm14 = vcmask 769024   ;;  %vm476_vm15 = vcmask 588800  }
  0x10   :  { %138 = vrot.lane.b32.xlu1 %v135_v11, %s1055_s28  ;;  %136 = vrot.lane.b32.xlu0 %v131_v12, %s1055_s28 }
  0x14   :  { %178 = vrot.lane.b32.xlu1 %v175_v14, %s1057_s13  ;;  %176 = vrot.lane.b32.xlu0 %v171_v15, %s1057_s13  ;;  %s1065_s13 = smov 112  }
  0x18   :  { %238 = vrot.lane.b32.xlu1 %v235_v17, %s1058_s16  ;;  %236 = vrot.lane.b32.xlu0 %v231_v18, %s1058_s16  ;;  %s1069_s16 = smov 95  }
  0x1c   :  { %280 = vrot.lane.b32.xlu1 %v277_v20, %s1059_s19  ;;  %278 = vrot.lane.b32.xlu0 %v273_v21, %s1059_s19 }
  0x20   :  { %302 = vrot.lane.b32.xlu1 %v299_v23, %s1059_s19  ;;  %300 = vrot.lane.b32.xlu0 %v295_v24, %s1059_s19 }
  0x24   :  { %342 = vrot.lane.b32.xlu1 %v339_v26, %s1060_s24  ;;  %340 = vrot.lane.b32.xlu0 %v335_v27, %s1060_s24 }
  0x28   :  { %383 = vrot.lane.b32.xlu1 %v380_v29, %s1061_s27  ;;  %381 = vrot.lane.b32.xlu0 %v376_v30, %s1061_s27 }
  0x2c   :  { %405 = vrot.lane.b32.xlu1 %v402_v32, %s1061_s27  ;;  %403 = vrot.lane.b32.xlu0 %v398_v33, %s1061_s27 }
  0x30   :  { %1011 = vrot.lane.b32.xlu0 %v1010_v36, %s1062_s9 }
  0x34   :  { %210 = vrot.lane.b32.xlu0 %v1181_v37, %s1062_s9 }
  0x7a   :  { %v114_v38 = vpop.permute.xlu1 %113  ;;  %v73_v39 = vpop.permute.xlu0 %72 }
  0x7b   :  { %v81_v40 = vmul.f32 %v1181_v37, %v73_v39  ;;  %v122_v51 = vmul.f32 %v114_v38, %v1181_v37 }
  0x7d   :  { %87 = vrot.lane.b32.xlu1 %v81_v40, %s1063_s12 }
  0x7e   :  { %v116_v41 = vpop.permute.xlu1 %115  ;;  %v75_v42 = vpop.permute.xlu0 %74 }
  0x7f   :  { %v77_v43 = vsel %vm76_vm0, %v73_v39, %v75_v42  ;;  %v83_v44 = vmul.f32 %v1174_v35, %v75_v42  ;;  %v118_v46 = vsel %vm117_vm1, %v114_v38, %v116_v41  ;;  %v124_v53 = vmul.f32 %v1174_v35, %v116_v41 }
  0x80   :  { %v82_v45 = vmul.f32 %v1169_v34, %v77_v43  ;;  %v123_v52 = vmul.f32 %v1169_v34, %v118_v46  ;;  %v1071_v46 = vmov 0  }
  0x81   :  { %1045 = vset.pattern.permute.xlu1 %v1071_v46  ;;  %1046 = vset.pattern.permute.xlu0 %v1071_v46 }
  0x82   :  { %v1015_v47 = vpack.i.bf16 %v83_v44, %v82_v45  ;;  %v139_v48 = vpop.permute.xlu1 %138  ;;  %v137_v49 = vpop.permute.xlu0 %136 }
  0x83   :  { %v140_v50 = vsel %vm117_vm1, %v137_v49, %v139_v48  ;;  %v146_v54 = vmul.f32 %v139_v48, %v124_v53  ;;  %v144_v55 = vmul.f32 %v137_v49, %v122_v51  ;;  %v454_v48 = vld [vmem:[%s1373_s3 + $0x10] sm:$0xff]  ;;  %v455_v49 = vld [vmem:[%s1373_s3 + $0x18] sm:$0xff]  ;;  %v28_v51 = vld [vmem:[%s1371_s1] ss:$4 sm:$0x3] }
  0x84   :  { %1016 = vrot.lane.b32.xlu0 %v1015_v47, %s1063_s12  ;;  %v145_v56 = vmul.f32 %v140_v50, %v123_v52  ;;  %v452_v47 = vld [vmem:[%s1373_s3] sm:$0xff]  ;;  %v37_v52 = vrot.slane %v28_v51, %v1120_v5  ;;  %v33_v53 = vrot.slane %v28_v51, %v1118_v4 }
  0x85   :  { %v430_v51 = vld [vmem:[%s1374_s2] sm:$0xff] }
  0x86   :  { %v179_v57 = vpop.permute.xlu1 %178  ;;  %v177_v58 = vpop.permute.xlu0 %176  ;;  %v1035_v63 = vpack.i.bf16 %v146_v54, %v145_v56  ;;  %v940_v54 = vld [vmem:[%s1371_s1 + $0x2] ss:$4 sm:$0x3]  ;;  %v41_v56 = vmul.f32 %v1169_v34, %v37_v52 }
  0x87   :  { %v185_v59 = vmul.f32 %v177_v58, %v1181_v37  ;;  %v181_v60 = vsel %vm180_vm2, %v177_v58, %v179_v57  ;;  %v187_v0 = vmul.f32 %v1174_v35, %v179_v57  ;;  %v52_v57 = vrot.slane %v940_v54, %v1120_v5 }
  0x88   :  { %150 = vrot.lane.b32.xlu0 %v144_v55, %s1064_s0  ;;  %v186_v1 = vmul.f32 %v1169_v34, %v181_v60  ;;  %v40_v58 = vmul.f32 %v1181_v37, %v33_v53  ;;  %v431_v53 = vld [vmem:[%s1374_s2 + $0x8] sm:$0xff] }
  0x89   :  { %191 = vrot.lane.b32.xlu1 %v185_v59, %s1065_s13  ;;  %v48_v59 = vrot.slane %v940_v54, %v1118_v4  ;;  %v432_v54 = vld [vmem:[%s1374_s2 + $0x10] sm:$0xff] }
  0x8a   :  { %v239_v61 = vpop.permute.xlu1 %238  ;;  %v237_v62 = vpop.permute.xlu0 %236  ;;  %v1020_v11 = vpack.i.bf16 %v187_v0, %v186_v1 }
  0x8b   :  { %v245_v2 = vmul.f32 %v237_v62, %v1181_v37  ;;  %v241_v3 = vsel %vm240_vm3, %v237_v62, %v239_v61  ;;  %v247_v8 = vmul.f32 %v239_v61, %v1174_v35  ;;  %v56_v61 = vmul.f32 %v52_v57, %v41_v56 }
  0x8c   :  { %1036 = vrot.lane.b32.xlu0 %v1035_v63, %s1064_s0  ;;  %v246_v9 = vmul.f32 %v241_v3, %v1169_v34  ;;  %v55_v62 = vmul.f32 %v48_v59, %v40_v58 }
  0x8d   :  { %251 = vrot.lane.b32.xlu1 %v245_v2, %s1066_s14 }
  0x8e   :  { %v281_v6 = vpop.permute.xlu1 %280  ;;  %v279_v7 = vpop.permute.xlu0 %278  ;;  %v1025_v20 = vpack.i.bf16 %v247_v8, %v246_v9 }
  0x8f   :  { %v283_v10 = vsel %vm282_vm4, %v279_v7, %v281_v6  ;;  %v289_v12 = vmul.f32 %v281_v6, %v1174_v35  ;;  %v287_v13 = vmul.f32 %v279_v7, %v1181_v37 }
  0x90   :  { %v288_v14 = vmul.f32 %v283_v10, %v1169_v34 }
  0x91   :  { %1021 = vrot.lane.b32.xlu1 %v1020_v11, %s1065_s13 }
  0x92   :  { %v303_v15 = vpop.permute.xlu1 %302  ;;  %v301_v16 = vpop.permute.xlu0 %300 }
  0x93   :  { %v310_v17 = vmul.f32 %v303_v15, %v289_v12  ;;  %v304_v18 = vsel %vm282_vm4, %v301_v16, %v303_v15  ;;  %v308_v19 = vmul.f32 %v301_v16, %v287_v13 }
  0x94   :  { %v309_v21 = vmul.f32 %v304_v18, %v288_v14 }
  0x95   :  { %314 = vrot.lane.b32.xlu0 %v308_v19, %s1067_s15  ;;  %1026 = vrot.lane.b32.xlu1 %v1025_v20, %s1066_s14 }
  0x96   :  { %v343_v22 = vpop.permute.xlu1 %342  ;;  %v341_v23 = vpop.permute.xlu0 %340  ;;  %v1040_v24 = vpack.i.bf16 %v310_v17, %v309_v21 }
  0x97   :  { %v351_v25 = vmul.f32 %v343_v22, %v1174_v35  ;;  %v345_v26 = vsel %vm344_vm5, %v341_v23, %v343_v22  ;;  %v349_v33 = vmul.f32 %v341_v23, %v1181_v37 }
  0x98   :  { %v350_v27 = vmul.f32 %v345_v26, %v1169_v34 }
  0x99   :  { %1041 = vrot.lane.b32.xlu0 %v1040_v24, %s1067_s15 }
  0x9a   :  { %v384_v28 = vpop.permute.xlu1 %383  ;;  %v382_v29 = vpop.permute.xlu0 %381  ;;  %v1030_v30 = vpack.i.bf16 %v351_v25, %v350_v27 }
  0x9b   :  { %v386_v32 = vsel %vm385_vm6, %v382_v29, %v384_v28  ;;  %v392_v41 = vmul.f32 %v384_v28, %v1174_v35  ;;  %v390_v43 = vmul.f32 %v382_v29, %v1181_v37  ;;  %v453_v35 = vld [vmem:[%s1373_s3 + $0x8] sm:$0xff] }
  0x9c   :  { %1031 = vrot.lane.b32.xlu1 %v1030_v30, %s1069_s16  ;;  %v391_v36 = vmul.f32 %v386_v32, %v1169_v34 }
  0x9e   :  { %v406_v38 = vpop.permute.xlu1 %405  ;;  %v404_v39 = vpop.permute.xlu0 %403 }
  0x9f   :  { %v407_v40 = vsel %vm385_vm6, %v404_v39, %v406_v38  ;;  %v413_v44 = vmul.f32 %v406_v38, %v392_v41  ;;  %v411_v45 = vmul.f32 %v404_v39, %v390_v43 }
  0xa0   :  { %v412_v42 = vmul.f32 %v407_v40, %v391_v36  ;;  %355 = vrot.lane.b32.xlu1 %v349_v33, %s1069_s16 }
  0xa2   :  { %419 = vrot.lane.b32.xlu0 %v412_v42, %s1070_s17  ;;  %v1012_v50 = vpop.permute.xlu0 %1011 }
  0xa3   :  { %v1014_v13 = vunpack.i.h.bf16 %v1012_v50  ;;  %v1013_v14 = vunpack.i.l.bf16 %v1012_v50 }
  0xa4   :  { %421 = vrot.lane.b32.xlu1 %v413_v44, %s1070_s17 }
  0xa5   :  { %v218_v26 = vsel %vm216_vm10, %v1013_v14, %v1014_v13 }
  0xa6   :  { %417 = vrot.lane.b32.xlu0 %v411_v45, %s1070_s17  ;;  %v211_v55 = vpop.permute.xlu0 %210 }
  0xa7   :  { %v217_v25 = vsel %vm216_vm10, %v211_v55, %v1013_v14  ;;  %v433_v55 = vld [vmem:[%s1374_s2 + $0x18] sm:$0xff] }
  0xa8   :  { %458 = vperm.xlu1 %1045, %v452_v47  }
  0xaa   :  { %463 = vperm.xlu0 %1046, %v453_v35  }
  0xac   :  { %468 = vperm.xlu1 %1045, %v454_v48  }
  0xb0   :  { %473 = vperm.xlu1 %1045, %v455_v49  }
  0xef   :  { %v88_v63 = vpop.permute.xlu1 %87 }
  0xf6   :  { %v1017_v60 = vpop.permute.xlu0 %1016 }
  0xf7   :  { %v1019_v0 = vunpack.i.h.bf16 %v1017_v60  ;;  %v1018_v1 = vunpack.i.l.bf16 %v1017_v60 }
  0xf9   :  { %v95_v2 = vsel %vm93_vm7, %v1018_v1, %v1019_v0  ;;  %v94_v3 = vsel %vm93_vm7, %v88_v63, %v1018_v1 }
  0xfa   :  { %v151_v6 = vpop.permute.xlu0 %150  ;;  %v961_v7 = vpack.c.bf16 %v95_v2, %v56_v61  ;;  %v963_v8 = vpack.c.bf16 %v94_v3, %v55_v62 }
  0xfb   :  { %v192_v9 = vpop.permute.xlu1 %191 }
  0xfc   :  { %962 = vmatprep.subr.bf16.mxu0 %v961_v7 }
  0xfd   :  { %964 = vmatpush1.bf16.msra.mxu0 %v963_v8 }
  0xfe   :  { %v1037_v5 = vpop.permute.xlu0 %1036 }
  0xff   :  { %v252_v34 = vpop.permute.xlu1 %251  ;;  %v1039_v37 = vunpack.i.h.bf16 %v1037_v5  ;;  %v1038_v10 = vunpack.i.l.bf16 %v1037_v5 }
 0x101   :  { %v158_v15 = vsel %vm156_vm8, %v1038_v10, %v1039_v37  ;;  %v157_v17 = vsel %vm156_vm8, %v151_v6, %v1038_v10 }
 0x103   :  { %v1022_v4 = vpop.permute.xlu1 %1021 }
 0x104   :  { %v1024_v11 = vunpack.i.h.bf16 %v1022_v4  ;;  %v1023_v12 = vunpack.i.l.bf16 %v1022_v4 }
 0x106   :  { %v199_v16 = vsel %vm197_vm9, %v1023_v12, %v1024_v11  ;;  %v198_v18 = vsel %vm197_vm9, %v192_v9, %v1023_v12 }
 0x107   :  { %v315_v19 = vpop.permute.xlu0 %314  ;;  %v1027_v20 = vpop.permute.xlu1 %1026  ;;  %v965_v21 = vpack.c.bf16 %v199_v16, %v158_v15  ;;  %v967_v22 = vpack.c.bf16 %v198_v18, %v157_v17 }
 0x108   :  { %v1029_v23 = vunpack.i.h.bf16 %v1027_v20  ;;  %v1028_v24 = vunpack.i.l.bf16 %v1027_v20  ;;  %v578_v20 = vld [vmem:[%s1375_s6] sm:$0xff] }
 0x109   :  { %966 = vmatprep.subr.bf16.mxu0 %v965_v21 }
 0x10a   :  { %968 = vmatpush1.bf16.msra.mxu0 %v967_v22  ;;  %v259_v27 = vsel %vm257_vm11, %v1028_v24, %v1029_v23  ;;  %v258_v28 = vsel %vm257_vm11, %v252_v34, %v1028_v24 }
 0x10b   :  { %v1042_v29 = vpop.permute.xlu0 %1041  ;;  %v969_v30 = vpack.c.bf16 %v259_v27, %v218_v26  ;;  %v971_v32 = vpack.c.bf16 %v258_v28, %v217_v25  ;;  %v579_v26 = vld [vmem:[%s1375_s6 + $0x8] sm:$0xff]  ;;  %v580_v28 = vld [vmem:[%s1375_s6 + $0x10] sm:$0xff] }
 0x10c   :  { %v1044_v33 = vunpack.i.h.bf16 %v1042_v29  ;;  %v1043_v36 = vunpack.i.l.bf16 %v1042_v29  ;;  %v581_v29 = vld [vmem:[%s1375_s6 + $0x18] sm:$0xff] }
 0x10d   :  { %970 = vmatprep.subr.bf16.mxu0 %v969_v30 }
 0x10e   :  { %v1032_v38 = vpop.permute.xlu1 %1031  ;;  %972 = vmatpush1.bf16.msra.mxu0 %v971_v32  ;;  %v322_v41 = vsel %vm320_vm12, %v1043_v36, %v1044_v33  ;;  %v321_v45 = vsel %vm320_vm12, %v315_v19, %v1043_v36 }
 0x10f   :  { %v1034_v39 = vunpack.i.h.bf16 %v1032_v38  ;;  %v1033_v40 = vunpack.i.l.bf16 %v1032_v38 }
 0x111   :  { %v363_v42 = vsel %vm361_vm13, %v1033_v40, %v1034_v39 }
 0x112   :  { %v356_v43 = vpop.permute.xlu1 %355  ;;  %v973_v44 = vpack.c.bf16 %v363_v42, %v322_v41 }
 0x113   :  { %v362_v46 = vsel %vm361_vm13, %v356_v43, %v1033_v40 }
 0x114   :  { %v975_v47 = vpack.c.bf16 %v362_v46, %v321_v45  ;;  %v420_v35 = vpop.permute.xlu0 %419  ;;  %974 = vmatprep.subr.bf16.mxu0 %v973_v44 }
 0x116   :  { %v422_v48 = vpop.permute.xlu1 %421  ;;  %976 = vmatpush1.bf16.msra.mxu0 %v975_v47 }
 0x117   :  { %v425_v49 = vsel %vm423_vm14, %v420_v35, %v422_v48 }
 0x118   :  { %v418_v50 = vpop.permute.xlu0 %417  ;;  %505 = vmatprep.subr.mxu0 %v425_v49 }
 0x119   :  { %v424_v52 = vsel %vm423_vm14, %v418_v50, %v420_v35 }
 0x11a   :  { %506 = vmatpush1.msra.mxu0 %v424_v52 }
 0x11b   :  { %949 = vmatmul.mubr.msk.f32.vlgmr.msra.gmra.mrb[0].mxu0 %vm476_vm15, %v430_v51 }
 0x11c   :  { %559 = vmatprep.mubr.f32.mxu0 %v1068_v31 }
 0x11f   :  { %950 = vmatmul.mubr.msk.f32.gmra.mrb[2].mxu0 %vm476_vm15, %v431_v53 }
 0x120   :  { %565 = vmatprep.mubr.f32.mxu0 %v1068_v31 }
 0x123   :  { %951 = vmatmul.mubr.msk.f32.gmra.mrb[4].mxu0 %vm476_vm15, %v432_v54 }
 0x124   :  { %571 = vmatprep.mubr.f32.mxu0 %v1068_v31 }
 0x127   :  { %952 = vmatmul.mubr.msk.f32.gmra.mrb[6].mxu0 %vm476_vm15, %v433_v55  ;;  %v459_v56 = vpop.permute.xlu1 %458 }
 0x129   :  { %v464_v59 = vpop.permute.xlu0 %463 }
 0x12b   :  { %v469_v63 = vpop.permute.xlu1 %468 }
 0x12f   :  { %v474_v9 = vpop.permute.xlu1 %473 }
 0x1ee   :  { %v555_v57 = vpop.f32.mrb[0].mxu0 }
 0x1ef   :  { %v557_v58 = vpop.f32.mrb[1].mxu0  ;;  %v1254_v2 = vadd.f32 %v555_v57, %v459_v56 }
 0x1f0   :  { %v1250_v0 = vadd.f32 %v557_v58, %v459_v56 }
 0x1f1   :  { %v683_v19 = vmul.f32 %v1254_v2, %v1254_v2 }
 0x1f2   :  { %v561_v60 = vpop.f32.mrb[2].mxu0  ;;  %v684_v13 = vmul.f32 %v1250_v0, %v1250_v0 }
 0x1f3   :  { %v1248_v61 = vadd.f32 %v561_v60, %v464_v59  ;;  %v563_v62 = vpop.f32.mrb[3].mxu0 }
 0x1f4   :  { %v1252_v1 = vadd.f32 %v563_v62, %v464_v59 }
 0x1f5   :  { %v979_v8 = vpack.c.bf16 %v1248_v61, %v1254_v2  ;;  %v685_v15 = vmul.f32 %v1248_v61, %v1248_v61 }
 0x1f6   :  { %v567_v3 = vpop.f32.mrb[4].mxu0  ;;  %v977_v6 = vpack.c.bf16 %v1252_v1, %v1250_v0  ;;  %v686_v10 = vmul.f32 %v1252_v1, %v1252_v1 }
 0x1f7   :  { %v569_v7 = vpop.f32.mrb[5].mxu0  ;;  %v1268_v12 = vadd.f32 %v567_v3, %v469_v63  ;;  %v987_v22 = vpack.c.bf16 %v685_v15, %v683_v19 }
 0x1f8   :  { %978 = vmatprep.subr.bf16.mxu1 %v977_v6  ;;  %v1264_v4 = vadd.f32 %v569_v7, %v469_v63  ;;  %v985_v18 = vpack.c.bf16 %v686_v10, %v684_v13 }
 0x1f9   :  { %980 = vmatpush1.bf16.msra.mxu1 %v979_v8  ;;  %v687_v25 = vmul.f32 %v1268_v12, %v1268_v12 }
 0x1fa   :  { %v573_v5 = vpop.f32.mrb[6].mxu0  ;;  %v688_v21 = vmul.f32 %v1264_v4, %v1264_v4 }
 0x1fb   :  { %v1260_v34 = vadd.f32 %v573_v5, %v474_v9  ;;  %v575_v37 = vpop.f32.mrb[7].mxu0 }
 0x1fc   :  { %v1266_v11 = vadd.f32 %v575_v37, %v474_v9 }
 0x1fd   :  { %v983_v16 = vpack.c.bf16 %v1260_v34, %v1268_v12  ;;  %v689_v23 = vmul.f32 %v1260_v34, %v1260_v34 }
 0x1fe   :  { %v981_v14 = vpack.c.bf16 %v1266_v11, %v1264_v4  ;;  %v690_v17 = vmul.f32 %v1266_v11, %v1266_v11 }
 0x1ff   :  { %v991_v27 = vpack.c.bf16 %v689_v23, %v687_v25  ;;  %v820_v25 = vld [vmem:[%s1376_s4] sm:$0xff] }
 0x200   :  { %982 = vmatprep.subr.bf16.mxu1 %v981_v14  ;;  %v989_v24 = vpack.c.bf16 %v690_v17, %v688_v21 }
 0x201   :  { %984 = vmatpush1.bf16.msra.mxu1 %v983_v16 }
 0x202   :  { %986 = vmatprep.subr.bf16.mxu1 %v985_v18 }
 0x204   :  { %953 = vmatmul.mubr.msk.f32.vlgmr.msra.gmra.mrb[0].mxu1 %vm282_vm4, %v578_v20 }
 0x205   :  { %988 = vmatpush1.bf16.msra.mxu1 %v987_v22  ;;  %664 = vmatprep.mubr.f32.mxu1 %v1068_v31 }
 0x206   :  { %990 = vmatprep.subr.bf16.mxu1 %v989_v24 }
 0x208   :  { %954 = vmatmul.mubr.msk.f32.gmra.mrb[2].mxu1 %vm282_vm4, %v579_v26 }
 0x209   :  { %992 = vmatpush1.bf16.msra.mxu1 %v991_v27  ;;  %670 = vmatprep.mubr.f32.mxu1 %v1068_v31 }
 0x20c   :  { %955 = vmatmul.mubr.msk.f32.gmra.mrb[4].mxu1 %vm282_vm4, %v580_v28 }
 0x20d   :  { %676 = vmatprep.mubr.f32.mxu1 %v1068_v31 }
 0x210   :  { %956 = vmatmul.mubr.msk.f32.gmra.mrb[6].mxu1 %vm282_vm4, %v581_v29 }
 0x211   :  { %755 = vmatprep.mubr.f32.mxu1 %v1068_v31 }
 0x214   :  { %957 = vmatmul.mubr.msk.f32.vlgmr.msra.gmra.mrb[8].mxu1 %vm282_vm4, %v578_v20 }
 0x215   :  { %761 = vmatprep.mubr.f32.mxu1 %v1068_v31 }
 0x218   :  { %958 = vmatmul.mubr.msk.f32.gmra.mrb[10].mxu1 %vm282_vm4, %v579_v26 }
 0x219   :  { %767 = vmatprep.mubr.f32.mxu1 %v1068_v31 }
 0x21c   :  { %959 = vmatmul.mubr.msk.f32.gmra.mrb[12].mxu1 %vm282_vm4, %v580_v28 }
 0x21d   :  { %773 = vmatprep.mubr.f32.mxu1 %v1068_v31 }
 0x220   :  { %960 = vmatmul.mubr.msk.f32.gmra.mrb[14].mxu1 %vm282_vm4, %v581_v29  ;;  %v821_v29 = vld [vmem:[%s1376_s4 + $0x8] sm:$0xff] }
 0x2d7   :  { %v660_v30 = vpop.f32.mrb[0].mxu1 }
 0x2d8   :  { %v662_v32 = vpop.f32.mrb[1].mxu1 }
 0x2d9   :  { %v780_v33 = vadd.f32 %v662_v32, %v660_v30 }
 0x2db   :  { %781 = vadd.xlane.f32.xlu0 %v780_v33  ;;  %v666_v36 = vpop.f32.mrb[2].mxu1 }
 0x2dc   :  { %v668_v38 = vpop.f32.mrb[3].mxu1 }
 0x2dd   :  { %v783_v39 = vadd.f32 %v668_v38, %v666_v36  ;;  %v822_v36 = vld [vmem:[%s1376_s4 + $0x10] sm:$0xff]  ;;  %v836_v38 = vld [vmem:[%s1377_s5] sm:$0xff] }
 0x2df   :  { %784 = vadd.xlane.f32.xlu1 %v783_v39  ;;  %v672_v40 = vpop.f32.mrb[4].mxu1 }
 0x2e0   :  { %v674_v41 = vpop.f32.mrb[5].mxu1 }
 0x2e1   :  { %v786_v42 = vadd.f32 %v674_v41, %v672_v40 }
 0x2e3   :  { %787 = vadd.xlane.f32.xlu0 %v786_v42  ;;  %v678_v43 = vpop.f32.mrb[6].mxu1 }
 0x2e4   :  { %v680_v44 = vpop.f32.mrb[7].mxu1 }
 0x2e5   :  { %v789_v45 = vadd.f32 %v680_v44, %v678_v43  ;;  %v837_v43 = vld [vmem:[%s1377_s5 + $0x8] sm:$0xff]  ;;  %v838_v44 = vld [vmem:[%s1377_s5 + $0x10] sm:$0xff] }
 0x2e7   :  { %790 = vadd.xlane.f32.xlu0 %v789_v45  ;;  %v757_v46 = vpop.f32.mrb[8].mxu1  ;;  %v823_v45 = vld [vmem:[%s1376_s4 + $0x18] sm:$0xff] }
 0x2e8   :  { %v759_v31 = vpop.f32.mrb[9].mxu1 }
 0x2e9   :  { %v796_v47 = vadd.f32 %v759_v31, %v757_v46 }
 0x2eb   :  { %797 = vadd.xlane.f32.xlu1 %v796_v47  ;;  %v763_v35 = vpop.f32.mrb[10].mxu1 }
 0x2ec   :  { %v765_v48 = vpop.f32.mrb[11].mxu1 }
 0x2ed   :  { %v799_v49 = vadd.f32 %v765_v48, %v763_v35 }
 0x2ef   :  { %800 = vadd.xlane.f32.xlu0 %v799_v49  ;;  %v769_v50 = vpop.f32.mrb[12].mxu1 }
 0x2f0   :  { %v771_v51 = vpop.f32.mrb[13].mxu1 }
 0x2f1   :  { %v802_v52 = vadd.f32 %v771_v51, %v769_v50  ;;  %v839_v50 = vld [vmem:[%s1377_s5 + $0x18] sm:$0xff] }
 0x2f3   :  { %803 = vadd.xlane.f32.xlu1 %v802_v52  ;;  %v775_v53 = vpop.f32.mrb[14].mxu1 }
 0x2f4   :  { %v777_v54 = vpop.f32.mrb[15].mxu1 }
 0x2f5   :  { %v805_v55 = vadd.f32 %v777_v54, %v775_v53 }
 0x2f7   :  { %806 = vadd.xlane.f32.xlu0 %v805_v55 }
 0x368   :  { %v782_v56 = vpop.xlane.xlu0 %781 }
 0x369   :  { %v792_v59 = vmul.f32 0.00048828125, %v782_v56 }
 0x36b   :  { %v812_v63 = vmul.f32 %v792_v59, %v792_v59 }
 0x36c   :  { %v785_v58 = vpop.xlane.xlu1 %784 }
 0x36d   :  { %v793_v3 = vmul.f32 0.00048828125, %v785_v58 }
 0x36f   :  { %v813_v9 = vmul.f32 %v793_v3, %v793_v3 }
 0x370   :  { %v788_v57 = vpop.xlane.xlu0 %787 }
 0x371   :  { %v794_v5 = vmul.f32 0.00048828125, %v788_v57 }
 0x373   :  { %v814_v15 = vmul.f32 %v794_v5, %v794_v5 }
 0x374   :  { %v791_v60 = vpop.xlane.xlu0 %790 }
 0x375   :  { %v795_v16 = vmul.f32 0.00048828125, %v791_v60 }
 0x377   :  { %v815_v21 = vmul.f32 %v795_v16, %v795_v16 }
 0x378   :  { %v798_v62 = vpop.xlane.xlu1 %797 }
 0x379   :  { %v808_v6 = vmul.f32 0.00048828125, %v798_v62 }
 0x37b   :  { %v816_v7 = vsub.f32 %v808_v6, %v812_v63 }
 0x37c   :  { %v801_v8 = vpop.xlane.xlu0 %800 }
 0x37d   :  { %v824_v37 = vadd.f32 1e-05, %v816_v7  ;;  %v809_v10 = vmul.f32 0.00048828125, %v801_v8 }
 0x37f   :  { %1047 = vrsqrt.f32 %v824_v37  ;;  %v817_v13 = vsub.f32 %v809_v10, %v813_v9 }
 0x380   :  { %v804_v14 = vpop.xlane.xlu1 %803 }
 0x381   :  { %v825_v17 = vadd.f32 1e-05, %v817_v13  ;;  %v810_v18 = vmul.f32 0.00048828125, %v804_v14 }
 0x383   :  { %1049 = vrsqrt.f32 %v825_v17  ;;  %v818_v19 = vsub.f32 %v810_v18, %v814_v15 }
 0x384   :  { %v807_v20 = vpop.xlane.xlu0 %806 }
 0x385   :  { %v826_v22 = vadd.f32 1e-05, %v818_v19  ;;  %v811_v23 = vmul.f32 0.00048828125, %v807_v20 }
 0x387   :  { %1051 = vrsqrt.f32 %v826_v22  ;;  %v819_v24 = vsub.f32 %v811_v23, %v815_v21 }
 0x389   :  { %v1048_v26 = vpop.eup %1047  ;;  %v827_v27 = vadd.f32 1e-05, %v819_v24 }
 0x38a   :  { %v832_v28 = vmul.f32 %v1048_v26, %v820_v25 }
 0x38b   :  { %1053 = vrsqrt.f32 %v827_v27 }
 0x38c   :  { %850 = vperm.xlu1 %1045, %v832_v28   ;;  %v840_v33 = vmul.f32 %v832_v28, %v792_v59 }
 0x38d   :  { %v1050_v30 = vpop.eup %1049 }
 0x38e   :  { %v833_v32 = vmul.f32 %v1050_v30, %v821_v29  ;;  %v844_v41 = vsub.f32 %v836_v38, %v840_v33 }
 0x390   :  { %855 = vperm.xlu0 %1046, %v833_v32   ;;  %v841_v42 = vmul.f32 %v833_v32, %v793_v3 }
 0x391   :  { %v1052_v39 = vpop.eup %1051 }
 0x392   :  { %v834_v40 = vmul.f32 %v1052_v39, %v822_v36  ;;  %v845_v47 = vsub.f32 %v837_v43, %v841_v42 }
 0x394   :  { %860 = vperm.xlu1 %1045, %v834_v40   ;;  %878 = vperm.xlu0 %1046, %v844_v41   ;;  %v842_v46 = vmul.f32 %v834_v40, %v794_v5 }
 0x395   :  { %v1054_v31 = vpop.eup %1053 }
 0x396   :  { %v846_v35 = vsub.f32 %v838_v44, %v842_v46  ;;  %v835_v48 = vmul.f32 %v1054_v31, %v823_v45 }
 0x398   :  { %883 = vperm.xlu1 %1045, %v845_v47   ;;  %888 = vperm.xlu0 %1046, %v846_v35   ;;  %v843_v49 = vmul.f32 %v835_v48, %v795_v16 }
 0x39a   :  { %v847_v51 = vsub.f32 %v839_v50, %v843_v49 }
 0x39c   :  { %865 = vperm.xlu1 %1045, %v835_v48  }
 0x3a0   :  { %893 = vperm.xlu1 %1045, %v847_v51  }
 0x40b   :  { %v851_v52 = vpop.permute.xlu1 %850 }
 0x40c   :  { %v868_v54 = vmul.f32 %v851_v52, %v1254_v2  ;;  %v869_v55 = vmul.f32 %v851_v52, %v1250_v0 }
 0x40f   :  { %v856_v53 = vpop.permute.xlu0 %855 }
 0x410   :  { %v870_v60 = vmul.f32 %v856_v53, %v1248_v61  ;;  %v871_v62 = vmul.f32 %v856_v53, %v1252_v1 }
 0x413   :  { %v861_v56 = vpop.permute.xlu1 %860  ;;  %v879_v57 = vpop.permute.xlu0 %878 }
 0x414   :  { %v896_v58 = vadd.f32 %v879_v57, %v868_v54  ;;  %v897_v59 = vadd.f32 %v879_v57, %v869_v55  ;;  %v872_v6 = vmul.f32 %v861_v56, %v1268_v12  ;;  %v873_v7 = vmul.f32 %v861_v56, %v1264_v4 }
 0x416   :  { %vm904_vm0 = vcmp.ge.f32.partialorder %v896_v58, 0.0  ;;  %vm905_vm1 = vcmp.ge.f32.partialorder %v897_v59, 0.0  ;;  %v912_v63 = vmul.f32 0.2, %v896_v58  ;;  %v913_v3 = vmul.f32 0.2, %v897_v59 }
 0x417   :  { %v884_v8 = vpop.permute.xlu1 %883  ;;  %v889_v2 = vpop.permute.xlu0 %888 }
 0x418   :  { %v920_v9 = vsel %vm904_vm0, %v896_v58, %v912_v63  ;;  %v921_v0 = vsel %vm905_vm1, %v897_v59, %v913_v3  ;;  %v898_v5 = vadd.f32 %v884_v8, %v870_v60  ;;  %v899_v37 = vadd.f32 %v884_v8, %v871_v62 }
 0x419   :  { %928 = vst [vmem:[%s1378_s7] sm:$0xff] %v920_v9  ;;  %929 = vst [vmem:[%s1378_s7 + $0x8] sm:$0xff] %v921_v0  ;;  %v900_v61 = vadd.f32 %v889_v2, %v872_v6  ;;  %v901_v1 = vadd.f32 %v889_v2, %v873_v7 }
 0x41a   :  { %vm906_vm2 = vcmp.ge.f32.partialorder %v898_v5, 0.0  ;;  %vm907_vm3 = vcmp.ge.f32.partialorder %v899_v37, 0.0  ;;  %v914_v12 = vmul.f32 0.2, %v898_v5  ;;  %v915_v4 = vmul.f32 0.2, %v899_v37 }
 0x41b   :  { %vm908_vm4 = vcmp.ge.f32.partialorder %v900_v61, 0.0  ;;  %vm909_vm5 = vcmp.ge.f32.partialorder %v901_v1, 0.0  ;;  %v916_v10 = vmul.f32 0.2, %v900_v61  ;;  %v917_v13 = vmul.f32 0.2, %v901_v1  ;;  %v866_v14 = vpop.permute.xlu1 %865 }
 0x41c   :  { %v922_v15 = vsel %vm906_vm2, %v898_v5, %v914_v12  ;;  %v923_v16 = vsel %vm907_vm3, %v899_v37, %v915_v4  ;;  %v874_v19 = vmul.f32 %v866_v14, %v1260_v34  ;;  %v875_v20 = vmul.f32 %v866_v14, %v1266_v11 }
 0x41d   :  { %930 = vst [vmem:[%s1378_s7 + $0x10] sm:$0xff] %v922_v15  ;;  %931 = vst [vmem:[%s1378_s7 + $0x18] sm:$0xff] %v923_v16  ;;  %v924_v17 = vsel %vm908_vm4, %v900_v61, %v916_v10  ;;  %v925_v18 = vsel %vm909_vm5, %v901_v1, %v917_v13 }
 0x41e   :  { %932 = vst [vmem:[%s1378_s7 + $0x20] sm:$0xff] %v924_v17  ;;  %933 = vst [vmem:[%s1378_s7 + $0x28] sm:$0xff] %v925_v18 }
 0x41f   :  { %v894_v21 = vpop.permute.xlu1 %893 }
 0x420   :  { %v902_v22 = vadd.f32 %v894_v21, %v874_v19  ;;  %v903_v23 = vadd.f32 %v894_v21, %v875_v20 }
 0x422   :  { %vm910_vm6 = vcmp.ge.f32.partialorder %v902_v22, 0.0  ;;  %vm911_vm7 = vcmp.ge.f32.partialorder %v903_v23, 0.0  ;;  %v918_v24 = vmul.f32 0.2, %v902_v22  ;;  %v919_v25 = vmul.f32 0.2, %v903_v23 }
 0x424   :  { %v926_v26 = vsel %vm910_vm6, %v902_v22, %v918_v24  ;;  %v927_v27 = vsel %vm911_vm7, %v903_v23, %v919_v25 }
 0x425   :  { %934 = vst [vmem:[%s1378_s7 + $0x30] sm:$0xff] %v926_v26  ;;  %935 = vst [vmem:[%s1378_s7 + $0x38] sm:$0xff] %v927_v27 }

</bundles_post_ra>
